<compile_context>
chip_gen: v6e
topology: v6e:2x2x1
jax: 0.10.0
libtpu: 0.0.40
codegen_flags: <defaults>
</compile_context>

<pallas_src>
import jax
import jax.numpy as jnp
import numpy as np
from jax.experimental import pallas as pl
from jax.experimental.pallas import tpu as pltpu


def build_rope_cache(dim, max_seq_len=4096, base=10000):
    """Interleaved, per-head-dim RoPE tables of shape [max_seq_len, dim].

    cos_t[p, 2j] = cos_t[p, 2j+1] = cos(p * theta_j)
    sin_t[p, 2j] = -sin(p * theta_j);  sin_t[p, 2j+1] = +sin(p * theta_j)
    (sign of sin folded in so the kernel is a pure FMA).
    """
    half = dim // 2
    theta = 1.0 / (base ** (jnp.arange(0, dim, 2)[:half].astype(jnp.float32) / dim))
    seq_idx = jnp.arange(max_seq_len, dtype=jnp.float32)
    idx_theta = jnp.einsum("i,j->ij", seq_idx, theta)                    # [S, d/2]
    cos = jnp.cos(idx_theta)
    sin = jnp.sin(idx_theta)
    cos_t = jnp.repeat(cos, 2, axis=-1)                                  # [S, d]
    sin_t = jnp.stack([-sin, sin], axis=-1).reshape(max_seq_len, dim)    # [S, d]
    return cos_t, sin_t


def _rope_kernel(x_ref, cos_ref, sin_ref, bmat_ref, o_ref, cosb_ref, sinb_ref):
    # Blocks: x_ref / o_ref [1, ts, h*d];  cos_ref / sin_ref [ts, d] (f32);
    # bmat_ref [d, h*d] constant 0/1;  cosb_ref / sinb_ref VMEM scratch [ts, h*d] f32.

    # Broadcast the per-head-dim tables across heads once per seq tile.
    # Batch is the innermost ("arbitrary") grid axis, so bi == 0 runs first
    # for every seq tile and the scratch is valid for the remaining bi steps.
    @pl.when(pl.program_id(1) == 0)
    def _():
        cosb_ref[...] = jnp.dot(cos_ref[...], bmat_ref[...],
                                precision=jax.lax.Precision.HIGHEST,
                                preferred_element_type=jnp.float32)
        sinb_ref[...] = jnp.dot(sin_ref[...], bmat_ref[...],
                                precision=jax.lax.Precision.HIGHEST,
                                preferred_element_type=jnp.float32)

    x = x_ref[0]                           # [ts, hd], kept in the input dtype
    hd = x.shape[-1]
    # Pair swap along lanes: swapped[2j] = x[2j+1], swapped[2j+1] = x[2j].
    # pltpu.roll follows jnp.roll semantics: roll(x, k)[i] = x[(i - k) % n].
    prev = pltpu.roll(x, 1, 1)             # prev[i] = x[i-1]
    nxt = pltpu.roll(x, hd - 1, 1)         # nxt[i]  = x[i+1]
    lane = jax.lax.broadcasted_iota(jnp.int32, x.shape, 1)
    swapped = jnp.where((lane & 1) == 0, nxt, prev)
    # out[2j]   = x[2j]*cos - x[2j+1]*sin   (sign of sin folded into the table)
    # out[2j+1] = x[2j+1]*cos + x[2j]*sin
    # x / swapped stay in the input dtype; the multiply promotes to f32.
    out = x * cosb_ref[...] + swapped * sinb_ref[...]
    o_ref[0] = out.astype(o_ref.dtype)


def _vmem_limit_bytes():
    cap = 128 * 1024 * 1024
    try:
        info = pltpu.get_tpu_info()
        cap = int(getattr(info, "vmem_capacity_bytes", cap) or cap)
    except Exception:
        pass
    # Never request the full physical VMEM (v7x has only 64 MiB / TensorCore);
    # leave headroom for Mosaic-internal temporaries and semaphores.
    return max(32 * 1024 * 1024, min(64 * 1024 * 1024, cap - 16 * 1024 * 1024))


def _pick_seq_tile(seq_len, batch, d, hd, x_bytes, vmem_limit_bytes):
    # Sublane tile for the x dtype (8 for 4-byte, 16 for 2-byte, 32 for 1-byte).
    sub = {4: 8, 2: 16, 1: 32}.get(x_bytes, 8)
    # Bytes that do not scale with the seq tile: the broadcast matrix (and its
    # pipeline copy) plus headroom for Mosaic-internal scratch.
    fixed = 2 * d * hd * 4 + (4 << 20)
    budget = (vmem_limit_bytes * 3) // 4 - fixed
    # Per seq-row VMEM bytes:
    #   x in + out blocks, double-buffered:        2 * 2 * hd * x_bytes
    #   cos/sin (ts, d) blocks, double-buffered:   2 * 2 * d * 4
    #   cosb/sinb broadcast scratch (f32):         2 * hd * 4
    #   roll/select/FMA temporaries (the rolls break elementwise fusion):
    #     ~3 tiles in x dtype + ~4 tiles in f32/i32
    per_row = 4 * hd * x_bytes + 16 * d + 8 * hd + (3 * hd * x_bytes + 16 * hd)
    ts = max(sub, budget // max(per_row, 1))
    if batch == 1:
        # v7x has 2 TensorCores: keep at least 2 seq tiles so both get work.
        half = -(-seq_len // 2)
        ts = min(ts, max(sub, -(-half // sub) * sub))
    if ts >= seq_len:
        return seq_len
    return max(sub, (ts // sub) * sub)


def rotary_positional_embeddings(x, cos_t, sin_t, *, seq_tile=None):
    """x: [b, s, h, d]; cos_t / sin_t: [max_seq, d] from build_rope_cache."""
    # TODO(synk): input_pos gather path (cache[input_pos]) not implemented;
    # positions are always 0..s-1 (the module's default input_pos=None path).
    b, s, h, d = x.shape
    hd = h * d
    xf = x.reshape(b, s, hd)                 # contiguous reshape -> no HBM copy
    # Constant 0/1 head-broadcast matrix: bmat[i, k*d + i] = 1.
    bmat = jnp.tile(jnp.eye(d, dtype=jnp.float32), (1, h))           # [d, h*d]
    x_bytes = jnp.dtype(x.dtype).itemsize
    vmem_limit = _vmem_limit_bytes()
    ts = seq_tile if seq_tile is not None else _pick_seq_tile(
        s, b, d, hd, x_bytes, vmem_limit)
    n_st = pl.cdiv(s, ts)

    out = pl.pallas_call(
        _rope_kernel,
        out_shape=jax.ShapeDtypeStruct((b, s, hd), x.dtype),
        grid=(n_st, b),                      # batch innermost: tables/broadcast reused
        in_specs=[
            pl.BlockSpec((1, ts, hd), lambda si, bi: (bi, si, 0)),
            pl.BlockSpec((ts, d), lambda si, bi: (si, 0)),
            pl.BlockSpec((ts, d), lambda si, bi: (si, 0)),
            pl.BlockSpec((d, hd), lambda si, bi: (0, 0)),
        ],
        out_specs=pl.BlockSpec((1, ts, hd), lambda si, bi: (bi, si, 0)),
        scratch_shapes=[pltpu.VMEM((ts, hd), jnp.float32),
                        pltpu.VMEM((ts, hd), jnp.float32)],
        compiler_params=pltpu.CompilerParams(
            # Seq tiles are independent (sharded across TensorCores); batch must
            # stay "arbitrary" so bi == 0 runs first for every seq tile (the
            # broadcast scratch is refreshed there).
            dimension_semantics=("parallel", "arbitrary"),
            vmem_limit_bytes=vmem_limit,
        ),
        # TODO(synk): callers that can donate x could add input_output_aliases
        # to apply RoPE in place.
    )(xf, cos_t, sin_t, bmat)
    return out.reshape(b, s, h, d)


def _reference(x, cos_t, sin_t):
    b, s, h, d = x.shape
    half = d // 2
    cos = np.asarray(cos_t)[:s, 0:d:2][None, :, None, :]   # [1, s, 1, d/2]
    sin = np.asarray(sin_t)[:s, 1:d:2][None, :, None, :]
    xs = np.asarray(x).astype(np.float32).reshape(b, s, h, half, 2)
    o0 = xs[..., 0] * cos - xs[..., 1] * sin
    o1 = xs[..., 1] * cos + xs[..., 0] * sin
    out = np.stack([o0, o1], axis=-1).reshape(b, s, h, d)
    return out.astype(np.asarray(x).dtype)


if __name__ == "__main__":
    # small shapes: batch=2, seq=8, heads=4, head_dim=32  (h*d = 128 lanes)
    dim, n_heads = 32, 4
    max_seq_len = 64
    b, s = 2, 8

    cos_t, sin_t = build_rope_cache(dim, max_seq_len=max_seq_len, base=10000)

    key = jax.random.PRNGKey(0)
    x = jax.random.normal(key, (b, s, n_heads, dim), dtype=jnp.float32)

    rope = jax.jit(rotary_positional_embeddings)
    out = jax.block_until_ready(rope(x, cos_t, sin_t))

    ref = _reference(x, cos_t, sin_t)
    np.testing.assert_allclose(np.asarray(out), ref, atol=1e-4, rtol=1e-4)
    print("KERNEL_OK")
</pallas_src>

<mosaic_0001>
module attributes {stable_mosaic.version = 11 : i64} {
  func.func @_rope_kernel(%arg0: i32, %arg1: i32, %arg2: memref<1x8x128xf32, #tpu.memory_space<vmem>>, %arg3: memref<8x32xf32, #tpu.memory_space<vmem>>, %arg4: memref<8x32xf32, #tpu.memory_space<vmem>>, %arg5: memref<32x128xf32, #tpu.memory_space<vmem>>, %arg6: memref<1x8x128xf32, #tpu.memory_space<vmem>>, %arg7: memref<8x128xf32, #tpu.memory_space<vmem>>, %arg8: memref<8x128xf32, #tpu.memory_space<vmem>>) attributes {dimension_semantics = [#tpu.dimension_semantics<parallel>, #tpu.dimension_semantics<arbitrary>], iteration_bounds = array<i64: 1, 2>, scalar_prefetch = 0 : i64, scratch_operands = 2 : i64, tpu.core_type = #tpu.core_type<tc>, window_params = [{transform_indices = @transform_0, window_bounds = array<i64: 1, 8, 128>}, {transform_indices = @transform_1, window_bounds = array<i64: 8, 32>}, {transform_indices = @transform_2, window_bounds = array<i64: 8, 32>}, {pipeline_mode = #tpu.pipeline_mode<synchronous>, transform_indices = @transform_3, window_bounds = array<i64: 32, 128>}, {transform_indices = @transform_4, window_bounds = array<i64: 1, 8, 128>}]} {
    %c0_i32 = arith.constant 0 : i32
    %0 = arith.cmpi eq, %arg1, %c0_i32 : i32
    %1 = arith.extui %0 : i1 to i32
    %c0_i32_0 = arith.constant 0 : i32
    %2 = arith.cmpi ne, %1, %c0_i32_0 : i32
    scf.if %2 {
      %c0_12 = arith.constant 0 : index
      %c0_13 = arith.constant 0 : index
      %21 = vector.load %arg3[%c0_12, %c0_13] : memref<8x32xf32, #tpu.memory_space<vmem>>, vector<8x32xf32>
      %c0_14 = arith.constant 0 : index
      %c0_15 = arith.constant 0 : index
      %22 = vector.load %arg5[%c0_14, %c0_15] : memref<32x128xf32, #tpu.memory_space<vmem>>, vector<32x128xf32>
      %cst = arith.constant dense<0.000000e+00> : vector<8x128xf32>
      %23 = tpu.matmul %21, %22, %cst {dimension_numbers = #tpu.dot_dimension_numbers<[1], [0], [0], [1], [0, 0, 1, 1], [], []>, precision = #tpu.contract_precision<fp32>} : vector<8x32xf32>, vector<32x128xf32>, vector<8x128xf32> -> vector<8x128xf32>
      %c0_16 = arith.constant 0 : index
      %c0_17 = arith.constant 0 : index
      %24 = vector.load %arg7[%c0_16, %c0_17] : memref<8x128xf32, #tpu.memory_space<vmem>>, vector<8x128xf32>
      tpu.vector_store %arg7[%c0_16, %c0_17], %23 {strides = array<i32>} : memref<8x128xf32, #tpu.memory_space<vmem>>, vector<8x128xf32>,
      %c0_18 = arith.constant 0 : index
      %c0_19 = arith.constant 0 : index
      %25 = vector.load %arg4[%c0_18, %c0_19] : memref<8x32xf32, #tpu.memory_space<vmem>>, vector<8x32xf32>
      %c0_20 = arith.constant 0 : index
      %c0_21 = arith.constant 0 : index
      %26 = vector.load %arg5[%c0_20, %c0_21] : memref<32x128xf32, #tpu.memory_space<vmem>>, vector<32x128xf32>
      %cst_22 = arith.constant dense<0.000000e+00> : vector<8x128xf32>
      %27 = tpu.matmul %25, %26, %cst_22 {dimension_numbers = #tpu.dot_dimension_numbers<[1], [0], [0], [1], [0, 0, 1, 1], [], []>, precision = #tpu.contract_precision<fp32>} : vector<8x32xf32>, vector<32x128xf32>, vector<8x128xf32> -> vector<8x128xf32>
      %c0_23 = arith.constant 0 : index
      %c0_24 = arith.constant 0 : index
      %28 = vector.load %arg8[%c0_23, %c0_24] : memref<8x128xf32, #tpu.memory_space<vmem>>, vector<8x128xf32>
      tpu.vector_store %arg8[%c0_23, %c0_24], %27 {strides = array<i32>} : memref<8x128xf32, #tpu.memory_space<vmem>>, vector<8x128xf32>,
    } else {
    }
    %c0 = arith.constant 0 : index
    %c0_1 = arith.constant 0 : index
    %c0_2 = arith.constant 0 : index
    %3 = vector.load %arg2[%c0, %c0_1, %c0_2] : memref<1x8x128xf32, #tpu.memory_space<vmem>>, vector<1x8x128xf32>
    %4 = vector.shape_cast %3 : vector<1x8x128xf32> to vector<8x128xf32>
    %c1_i32 = arith.constant 1 : i32
    %5 = tpu.dynamic_rotate %4 by %c1_i32 dim 1 : vector<8x128xf32>, i32 -> vector<8x128xf32>
    %c127_i32 = arith.constant 127 : i32
    %6 = tpu.dynamic_rotate %4 by %c127_i32 dim 1 : vector<8x128xf32>, i32 -> vector<8x128xf32>
    %7 = tpu.iota {dimensions = array<i32: 1>} : vector<8x128xi32>
    %c1_i32_3 = arith.constant 1 : i32
    %8 = vector.broadcast %c1_i32_3 : i32 to vector<8x128xi32>
    %9 = arith.andi %7, %8 : vector<8x128xi32>
    %c0_i32_4 = arith.constant 0 : i32
    %10 = vector.broadcast %c0_i32_4 : i32 to vector<8x128xi32>
    %11 = arith.cmpi eq, %9, %10 : vector<8x128xi32>
    %12 = arith.select %11, %6, %5 : vector<8x128xi1>, vector<8x128xf32>
    %c0_5 = arith.constant 0 : index
    %c0_6 = arith.constant 0 : index
    %13 = vector.load %arg7[%c0_5, %c0_6] : memref<8x128xf32, #tpu.memory_space<vmem>>, vector<8x128xf32>
    %14 = arith.mulf %4, %13 : vector<8x128xf32>
    %c0_7 = arith.constant 0 : index
    %c0_8 = arith.constant 0 : index
    %15 = vector.load %arg8[%c0_7, %c0_8] : memref<8x128xf32, #tpu.memory_space<vmem>>, vector<8x128xf32>
    %16 = arith.mulf %12, %15 : vector<8x128xf32>
    %17 = arith.addf %14, %16 : vector<8x128xf32>
    %c0_9 = arith.constant 0 : index
    %c0_10 = arith.constant 0 : index
    %c0_11 = arith.constant 0 : index
    %18 = vector.load %arg6[%c0_9, %c0_10, %c0_11] : memref<1x8x128xf32, #tpu.memory_space<vmem>>, vector<1x8x128xf32>
    %19 = vector.shape_cast %18 : vector<1x8x128xf32> to vector<8x128xf32>
    %20 = vector.shape_cast %17 : vector<8x128xf32> to vector<1x8x128xf32>
    tpu.vector_store %arg6[%c0_9, %c0_10, %c0_11], %20 {strides = array<i32>} : memref<1x8x128xf32, #tpu.memory_space<vmem>>, vector<1x8x128xf32>,
    return
  }
  func.func @transform_0(%arg0: i32, %arg1: i32) -> (i32, i32, i32) {
    %c0_i32 = arith.constant 0 : i32
    %c0_i32_0 = arith.constant 0 : i32
    return %arg1, %arg0, %c0_i32 : i32, i32, i32
  }
  func.func @transform_1(%arg0: i32, %arg1: i32) -> (i32, i32) {
    %c0_i32 = arith.constant 0 : i32
    %c0_i32_0 = arith.constant 0 : i32
    return %arg0, %c0_i32 : i32, i32
  }
  func.func @transform_2(%arg0: i32, %arg1: i32) -> (i32, i32) {
    %c0_i32 = arith.constant 0 : i32
    %c0_i32_0 = arith.constant 0 : i32
    return %arg0, %c0_i32 : i32, i32
  }
  func.func @transform_3(%arg0: i32, %arg1: i32) -> (i32, i32) {
    %c0_i32 = arith.constant 0 : i32
    %c0_i32_0 = arith.constant 0 : i32
    %c0_i32_1 = arith.constant 0 : i32
    return %c0_i32, %c0_i32_0 : i32, i32
  }
  func.func @transform_4(%arg0: i32, %arg1: i32) -> (i32, i32, i32) {
    %c0_i32 = arith.constant 0 : i32
    %c0_i32_0 = arith.constant 0 : i32
    return %arg1, %arg0, %c0_i32 : i32, i32, i32
  }
}

</mosaic_0001>

<bundles_post_ra>
// kernel: tile.9
= control target key start
LH: loop header
LB: loop body
LE: loop exit
PB: predicated region body
PF: predicated region fallthrough
CT: control target
= control target key end

     0   :  { %vm163_vm0 = vcmask 1047556   ;;  %s399_s10 = smov 96   ;;  %vm165_vm1 = vcmask 261120   ;;  %s401_s21 = smov 32   ;;  %vm202_vm2 = vcmask 1048320   ;;  %vm245_vm3 = vcmask 785920   ;;  %s580_s0 = inlined_call_operand.vmem [shape: f32[32,4,32], index: 0, kind: input, shape index: {}]   ;;  %s581_s1 = inlined_call_operand.vmem [shape: f32[32,128], index: 1, kind: output, shape index: {}]  }
   0x1   :  { %v377_v0 = vld [vmem:[%s580_s0 + $0x1c] sm:$0xf]  ;;  %v378_v1 = vld [vmem:[%s580_s0 + $0x18] sm:$0xf]  ;;  %v379_v2 = vld [vmem:[%s580_s0 + $0x14] sm:$0xf] }
   0x2   :  { %129 = vst [vmem:[#allocation0 + $0x38] sm:$0xf] %v377_v0  ;;  %134 = vst [vmem:[#allocation0 + $0x30] sm:$0xf] %v378_v1  ;;  %v380_v3 = vld [vmem:[%s580_s0 + $0x10] sm:$0xf] }
   0x3   :  { %139 = vst [vmem:[#allocation0 + $0x28] sm:$0xf] %v379_v2  ;;  %v381_v4 = vld [vmem:[%s580_s0 + $0xc] sm:$0xf]  ;;  %v382_v5 = vld [vmem:[%s580_s0 + $0x8] sm:$0xf] }
   0x4   :  { %144 = vst [vmem:[#allocation0 + $0x20] sm:$0xf] %v380_v3  ;;  %149 = vst [vmem:[#allocation0 + $0x18] sm:$0xf] %v381_v4  ;;  %v383_v6 = vld [vmem:[%s580_s0 + $0x4] sm:$0xf] }
   0x5   :  { %154 = vst [vmem:[#allocation0 + $0x10] sm:$0xf] %v382_v5  ;;  %v159_v7 = vld [vmem:[%s580_s0] sm:$0xf]  ;;  %158 = vst [vmem:[#allocation0 + $0x8] sm:$0xf] %v383_v6 }
   0x6   :  { %160 = vst [vmem:[#allocation0] sm:$0xf] %v159_v7  ;;  %v361_v8 = vld [vmem:[%s580_s0 + $0x5c] sm:$0xf]  ;;  %v362_v9 = vld [vmem:[%s580_s0 + $0x58] sm:$0xf] }
   0x7   :  { %v363_v10 = vld [vmem:[%s580_s0 + $0x54] sm:$0xf]  ;;  %49 = vst [vmem:[#allocation0 + $0xb8] sm:$0xf] %v361_v8  ;;  %54 = vst [vmem:[#allocation0 + $0xb0] sm:$0xf] %v362_v9 }
   0x8   :  { %59 = vst [vmem:[#allocation0 + $0xa8] sm:$0xf] %v363_v10  ;;  %v364_v11 = vld [vmem:[%s580_s0 + $0x50] sm:$0xf]  ;;  %v365_v12 = vld [vmem:[%s580_s0 + $0x4c] sm:$0xf] }
   0x9   :  { %v366_v13 = vld [vmem:[%s580_s0 + $0x48] sm:$0xf]  ;;  %64 = vst [vmem:[#allocation0 + $0xa0] sm:$0xf] %v364_v11  ;;  %69 = vst [vmem:[#allocation0 + $0x98] sm:$0xf] %v365_v12 }
   0xa   :  { %74 = vst [vmem:[#allocation0 + $0x90] sm:$0xf] %v366_v13  ;;  %v367_v14 = vld [vmem:[%s580_s0 + $0x44] sm:$0xf]  ;;  %v368_v15 = vld [vmem:[%s580_s0 + $0x40] sm:$0xf] }
   0xb   :  { %v369_v16 = vld [vmem:[%s580_s0 + $0x3c] sm:$0xf]  ;;  %79 = vst [vmem:[#allocation0 + $0x88] sm:$0xf] %v367_v14  ;;  %84 = vst [vmem:[#allocation0 + $0x80] sm:$0xf] %v368_v15 }
   0xc   :  { %89 = vst [vmem:[#allocation0 + $0x78] sm:$0xf] %v369_v16  ;;  %v370_v17 = vld [vmem:[%s580_s0 + $0x38] sm:$0xf]  ;;  %v371_v18 = vld [vmem:[%s580_s0 + $0x34] sm:$0xf] }
   0xd   :  { %v372_v19 = vld [vmem:[%s580_s0 + $0x30] sm:$0xf]  ;;  %94 = vst [vmem:[#allocation0 + $0x70] sm:$0xf] %v370_v17  ;;  %99 = vst [vmem:[#allocation0 + $0x68] sm:$0xf] %v371_v18 }
   0xe   :  { %104 = vst [vmem:[#allocation0 + $0x60] sm:$0xf] %v372_v19  ;;  %v373_v20 = vld [vmem:[%s580_s0 + $0x2c] sm:$0xf]  ;;  %v374_v21 = vld [vmem:[%s580_s0 + $0x28] sm:$0xf] }
   0xf   :  { %v375_v22 = vld [vmem:[%s580_s0 + $0x24] sm:$0xf]  ;;  %109 = vst [vmem:[#allocation0 + $0x58] sm:$0xf] %v373_v20  ;;  %114 = vst [vmem:[#allocation0 + $0x50] sm:$0xf] %v374_v21 }
  0x10   :  { %119 = vst [vmem:[#allocation0 + $0x48] sm:$0xf] %v375_v22  ;;  %v376_v23 = vld [vmem:[%s580_s0 + $0x20] sm:$0xf]  ;;  %v353_v24 = vld [vmem:[%s580_s0 + $0x7c] sm:$0xf] }
  0x11   :  { %v354_v25 = vld [vmem:[%s580_s0 + $0x78] sm:$0xf]  ;;  %124 = vst [vmem:[#allocation0 + $0x40] sm:$0xf] %v376_v23  ;;  %9 = vst [vmem:[#allocation0 + $0xf8] sm:$0xf] %v353_v24 }
  0x12   :  { %v197_v26 = vld [vmem:[#allocation0 + $0x3] ss:$8 sm:$0xf0]   ;;  %14 = vst [vmem:[#allocation0 + $0xf0] sm:$0xf] %v354_v25  ;;  %vm288_vm4 = vcmask 523520  }
  0x13   :  { %v355_v27 = vld [vmem:[%s580_s0 + $0x74] sm:$0xf]  ;;  %v195_v28 = vld [vmem:[#allocation0 + $0x3] ss:$8 sm:$0xf]  }
  0x14   :  { %19 = vst [vmem:[#allocation0 + $0xe8] sm:$0xf] %v355_v27  ;;  %v356_v29 = vld [vmem:[%s580_s0 + $0x70] sm:$0xf]  ;;  %v199_v30 = vsel %vm163_vm0, %v197_v26, %v195_v28  ;;  %v357_v31 = vld [vmem:[%s580_s0 + $0x6c] sm:$0xf] }
  0x15   :  { %24 = vst [vmem:[#allocation0 + $0xe0] sm:$0xf] %v356_v29  ;;  %v358_v32 = vld [vmem:[%s580_s0 + $0x68] sm:$0xf]  ;;  %v359_v33 = vld [vmem:[%s580_s0 + $0x64] sm:$0xf]  ;;  %200 = vrot.lane.b32.xlu0 %v199_v30, %s399_s10 }
  0x16   :  { %v218_v34 = vld [vmem:[#allocation0 + $0x83] ss:$8 sm:$0xf0]   ;;  %29 = vst [vmem:[#allocation0 + $0xd8] sm:$0xf] %v357_v31 }
  0x17   :  { %34 = vst [vmem:[#allocation0 + $0xd0] sm:$0xf] %v358_v32  ;;  %39 = vst [vmem:[#allocation0 + $0xc8] sm:$0xf] %v359_v33  ;;  %v360_v35 = vld [vmem:[%s580_s0 + $0x60] sm:$0xf] }
  0x18   :  { %v216_v36 = vld [vmem:[#allocation0 + $0x83] ss:$8 sm:$0xf]   ;;  %44 = vst [vmem:[#allocation0 + $0xc0] sm:$0xf] %v360_v35  ;;  %s400_s0 = smov 64  }
  0x19   :  { %v220_v37 = vsel %vm163_vm0, %v218_v34, %v216_v36  ;;  %v207_v38 = vld [vmem:[#allocation0 + $0x43] ss:$8 sm:$0xf0]   ;;  %v238_v39 = vld [vmem:[#allocation0 + $0x2] ss:$8 sm:$0xf]  }
  0x1a   :  { %221 = vrot.lane.b32.xlu1 %v220_v37, %s399_s10  ;;  %v205_v40 = vld [vmem:[#allocation0 + $0x43] ss:$8 sm:$0xf]   ;;  %v240_v41 = vld [vmem:[#allocation0 + $0x2] ss:$8 sm:$0xf0]  }
  0x1b   :  { %v209_v42 = vsel %vm163_vm0, %v207_v38, %v205_v40  ;;  %v250_v44 = vld [vmem:[#allocation0 + $0x42] ss:$8 sm:$0xf0]   ;;  %v242_v45 = vsel %vm163_vm0, %v240_v41, %v238_v39  ;;  %v281_v52 = vld [vmem:[#allocation0 + $0x1] ss:$8 sm:$0xf]  }
  0x1c   :  { %210 = vrot.lane.b32.xlu0 %v209_v42, %s399_s10  ;;  %v229_v43 = vld [vmem:[#allocation0 + $0xc3] ss:$8 sm:$0xf0]   ;;  %v248_v46 = vld [vmem:[#allocation0 + $0x42] ss:$8 sm:$0xf]  }
  0x1d   :  { %v259_v47 = vld [vmem:[#allocation0 + $0x82] ss:$8 sm:$0xf]   ;;  %v252_v53 = vsel %vm163_vm0, %v250_v44, %v248_v46  ;;  %v283_v55 = vld [vmem:[#allocation0 + $0x1] ss:$8 sm:$0xf0]  }
  0x1e   :  { %v261_v49 = vld [vmem:[#allocation0 + $0x82] ss:$8 sm:$0xf0]   ;;  %v161_v56 = vld [vmem:[#allocation0] ss:$8 sm:$0xf]   ;;  %v285_v4 = vsel %vm163_vm0, %v283_v55, %v281_v52 }
  0x1f   :  { %v227_v48 = vld [vmem:[#allocation0 + $0xc3] ss:$8 sm:$0xf]   ;;  %v272_v51 = vld [vmem:[#allocation0 + $0xc2] ss:$8 sm:$0xf0]   ;;  %v263_v54 = vsel %vm163_vm0, %v261_v49, %v259_v47 }
  0x20   :  { %v231_v50 = vsel %vm163_vm0, %v229_v43, %v227_v48  ;;  %243 = vrot.lane.b32.xlu0 %v242_v45, %s400_s0  ;;  %v270_v57 = vld [vmem:[#allocation0 + $0xc2] ss:$8 sm:$0xf]   ;;  %v162_v58 = vld [vmem:[#allocation0] ss:$8 sm:$0xf0]  }
  0x21   :  { %232 = vrot.lane.b32.xlu1 %v231_v50, %s399_s10  ;;  %v164_v59 = vsel %vm163_vm0, %v162_v58, %v161_v56  ;;  %v177_v60 = vld [vmem:[#allocation0 + $0x80] ss:$8 sm:$0xf]   ;;  %v291_v62 = vld [vmem:[#allocation0 + $0x41] ss:$8 sm:$0xf]   ;;  %v274_v3 = vsel %vm163_vm0, %v272_v51, %v270_v57 }
  0x22   :  { %v179_v61 = vld [vmem:[#allocation0 + $0x80] ss:$8 sm:$0xf0]   ;;  %v293_v63 = vld [vmem:[#allocation0 + $0x41] ss:$8 sm:$0xf0]  }
  0x23   :  { %166 = vst.msk [vmem:[%s581_s1] sm:$0xff] %vm165_vm1, %v164_v59   ;;  %v181_v0 = vsel %vm163_vm0, %v179_v61, %v177_v60  ;;  %v168_v1 = vld [vmem:[#allocation0 + $0x40] ss:$8 sm:$0xf]   ;;  %v295_v11 = vsel %vm163_vm0, %v293_v63, %v291_v62 }
  0x24   :  { %264 = vrot.lane.b32.xlu0 %v263_v54, %s400_s0  ;;  %v170_v2 = vld [vmem:[#allocation0 + $0x40] ss:$8 sm:$0xf0]   ;;  %385 = vst.msk [vmem:[%s581_s1 + $0x10] sm:$0xff] %vm165_vm1, %v181_v0  }
  0x25   :  { %253 = vrot.lane.b32.xlu1 %v252_v53, %s400_s0  ;;  %v172_v5 = vsel %vm163_vm0, %v170_v2, %v168_v1  ;;  %v186_v6 = vld [vmem:[#allocation0 + $0xc0] ss:$8 sm:$0xf]   ;;  %v302_v8 = vld [vmem:[#allocation0 + $0x81] ss:$8 sm:$0xf]  }
  0x26   :  { %v188_v7 = vld [vmem:[#allocation0 + $0xc0] ss:$8 sm:$0xf0]   ;;  %v304_v9 = vld [vmem:[#allocation0 + $0x81] ss:$8 sm:$0xf0]  }
  0x27   :  { %384 = vst.msk [vmem:[%s581_s1 + $0x8] sm:$0xff] %vm165_vm1, %v172_v5   ;;  %v190_v10 = vsel %vm163_vm0, %v188_v7, %v186_v6  ;;  %v306_v12 = vsel %vm163_vm0, %v304_v9, %v302_v8  ;;  %v313_v13 = vld [vmem:[#allocation0 + $0xc1] ss:$8 sm:$0xf]  }
  0x28   :  { %386 = vst.msk [vmem:[%s581_s1 + $0x18] sm:$0xff] %vm165_vm1, %v190_v10   ;;  %286 = vrot.lane.b32.xlu0 %v285_v4, %s401_s21  ;;  %v315_v14 = vld [vmem:[#allocation0 + $0xc1] ss:$8 sm:$0xf0]  }
  0x29   :  { %275 = vrot.lane.b32.xlu1 %v274_v3, %s400_s0  ;;  %v317_v15 = vsel %vm163_vm0, %v315_v14, %v313_v13 }
  0x2c   :  { %307 = vrot.lane.b32.xlu0 %v306_v12, %s401_s21 }
  0x2d   :  { %296 = vrot.lane.b32.xlu1 %v295_v11, %s401_s21 }
  0x31   :  { %318 = vrot.lane.b32.xlu1 %v317_v15, %s401_s21 }
  0x87   :  { %v201_v16 = vpop.permute.xlu0 %200  }
  0x88   :  { %203 = vst.msk [vmem:[%s581_s1] sm:$0xff] %vm202_vm2, %v201_v16  }
  0x8c   :  { %v222_v17 = vpop.permute.xlu1 %221  }
  0x8d   :  { %388 = vst.msk [vmem:[%s581_s1 + $0x10] sm:$0xff] %vm202_vm2, %v222_v17  }
  0x8e   :  { %v211_v18 = vpop.permute.xlu0 %210  }
  0x8f   :  { %387 = vst.msk [vmem:[%s581_s1 + $0x8] sm:$0xff] %vm202_vm2, %v211_v18  }
  0x92   :  { %v244_v20 = vpop.permute.xlu0 %243  }
  0x93   :  { %v233_v19 = vpop.permute.xlu1 %232   ;;  %246 = vst.msk [vmem:[%s581_s1] sm:$0xff] %vm245_vm3, %v244_v20  }
  0x94   :  { %389 = vst.msk [vmem:[%s581_s1 + $0x18] sm:$0xff] %vm202_vm2, %v233_v19  }
  0x96   :  { %v265_v22 = vpop.permute.xlu0 %264  }
  0x97   :  { %v254_v21 = vpop.permute.xlu1 %253   ;;  %391 = vst.msk [vmem:[%s581_s1 + $0x10] sm:$0xff] %vm245_vm3, %v265_v22  }
  0x98   :  { %390 = vst.msk [vmem:[%s581_s1 + $0x8] sm:$0xff] %vm245_vm3, %v254_v21  }
  0x9a   :  { %v287_v24 = vpop.permute.xlu0 %286  }
  0x9b   :  { %v276_v23 = vpop.permute.xlu1 %275   ;;  %289 = vst.msk [vmem:[%s581_s1] sm:$0xff] %vm288_vm4, %v287_v24  }
  0x9c   :  { %392 = vst.msk [vmem:[%s581_s1 + $0x18] sm:$0xff] %vm245_vm3, %v276_v23  }
  0x9e   :  { %v308_v26 = vpop.permute.xlu0 %307  }
  0x9f   :  { %v297_v25 = vpop.permute.xlu1 %296   ;;  %394 = vst.msk [vmem:[%s581_s1 + $0x10] sm:$0xff] %vm288_vm4, %v308_v26  }
  0xa0   :  { %393 = vst.msk [vmem:[%s581_s1 + $0x8] sm:$0xff] %vm288_vm4, %v297_v25  }
  0xa3   :  { %v319_v27 = vpop.permute.xlu1 %318  }
  0xa4   :  { %395 = vst.msk [vmem:[%s581_s1 + $0x18] sm:$0xff] %vm288_vm4, %v319_v27  }

// kernel: rotary_positional_embeddings.1
= control target key start
LH: loop header
LB: loop body
LE: loop exit
PB: predicated region body
PF: predicated region fallthrough
CT: control target
= control target key end

     0   :  { %s1657_s15 = smov 0   ;;  %s1659_s16 = smov 0   ;;  %s1901_s0 = inlined_call_operand.vmem [shape: f32[2,8,128], index: 0, kind: input, shape index: {}]   ;;  %s1902_s1 = inlined_call_operand.vmem [shape: f32[64,32], index: 1, kind: input, shape index: {}]   ;;  %s1903_s2 = inlined_call_operand.vmem [shape: f32[64,32], index: 2, kind: input, shape index: {}]   ;;  %s1904_s3 = inlined_call_operand.vmem [shape: f32[32,128], index: 3, kind: input, shape index: {}]   ;;  %s1905_s4 = inlined_call_operand.vmem [shape: f32[2,8,128], index: 4, kind: output, shape index: {}]  }
   0x1   :  { %s1661_s17 = smov 0  }
   0x2 LB: > { %s23_s18 = sadd.s32 1, %s1622_s16  ;;  %p1378_p0 = scmp.ge.s32.totalorder %s1626_s17, 1  ;;  %s1626_s17 = sphi %s1661_s17, %s14_s17   ;;  %s1622_s16 = sphi %s1659_s16, %s1907_s16   ;;  %s1618_s15 = sphi %s1657_s15, %s1906_s15  }
   0x3   : > { %p24_p1 = scmp.ge.s32.totalorder %s23_s18, 2  ;;  %p198_p2 = scmp.lt.s32.totalorder %s1626_s17, 3 }
   0x5   : > { %s1909_s18 = smov (%p24_p1, %s23_s18), 0  ;;  %p199_p3 = pnand %p1378_p0, %p198_p2 }
   0x6   : > { %p236_p4 = scmp.lt.s32.totalorder (!%p199_p3), %s1618_s15, 1  ;;  %p1381_p5 = scmp.ne.s32.totalorder (!%p199_p3), %s1618_s15, 0 }
   0x7   : > { %202 = sbr.rel (%p199_p3) target bundleno = 408 (0x198), region = 36 }
   0xc   : > { %s237_s19 = scalar_select %p236_p4, %s1618_s15, 1 }
   0xd   : > { %261 = sbr.rel (%p1381_p5) target bundleno = 282 (0x11a), region = 40 }
   0xe   : > { %s1379_s20 = sshll.u32 %s237_s19, 3 }
   0xf   : > { %s1678_s23 = scalar_lea.vmem %s1901_s0, %s1379_s20  ;;  %s1683_s26 = scalar_lea.vmem %s1905_s4, %s1379_s20 }
  0x12   : > { %v266_v0 = vld [vmem:[%s1904_s3 + $0x18] sm:$0xff]  ;;  %v265_v1 = vld [vmem:[%s1904_s3 + $0x10] sm:$0xff]  ;;  %v264_v2 = vld [vmem:[%s1904_s3 + $0x8] sm:$0xff]  ;;  %vm267_vm0 = vcmask 261120   ;;  %v1628_v3 = vmov 0.0   ;;  %vm1629_vm1 = vmmov 0  }
  0x13   : > { %1444 = vmatprep.subr.mxu0 %v1628_v3  ;;  %v1695_v4 = vand.u32 4294901760, %v266_v0  ;;  %v1697_v5 = vand.u32 4294901760, %v265_v1  ;;  %v1699_v6 = vand.u32 4294901760, %v264_v2  ;;  %1455 = vmatprep.subr.mxu1 %v1628_v3  ;;  %v263_v7 = vld [vmem:[%s1904_s3] sm:$0xff] }
  0x14   : > { %v262_v8 = vld [vmem:[%s1902_s1] sm:$0xff]  ;;  %v1708_v9 = vand.u32 4294901760, %v263_v7  ;;  %1452 = vmatprep.mubr.msk.f32.mxu0 %vm1629_vm1, %v1628_v3  ;;  %1463 = vmatprep.mubr.msk.f32.mxu1 %vm1629_vm1, %v1628_v3 }
  0x15   : > { %v269_v10 = vsel %vm267_vm0, %v262_v8, 0  ;;  %1445 = vmatpush3.msra.mxu0 %v1695_v4  ;;  %v1717_v11 = vsub.f32 %v266_v0, %v1695_v4  ;;  %v1722_v13 = vsub.f32 %v265_v1, %v1697_v5  ;;  %v1726_v14 = vsub.f32 %v264_v2, %v1699_v6  ;;  %v757_v32 = vld [vmem:[%s1903_s2] sm:$0xff] }
  0x16   : > { %v1719_v12 = vand.u32 4294901760, %v269_v10  ;;  %1446 = vmatprep.subr.mxu0 %v1628_v3  ;;  %v1729_v15 = vsub.f32 %v263_v7, %v1708_v9  ;;  %v763_v33 = vsel %vm267_vm0, %v757_v32, 0 }
  0x17   : > { %1447 = vmatpush3.msra.mxu0 %v1697_v5  ;;  %v1733_v16 = vand.u32 4294901760, %v1717_v11  ;;  %v1737_v18 = vand.u32 4294901760, %v1722_v13  ;;  %v1741_v19 = vand.u32 4294901760, %v1726_v14  ;;  %v1789_v34 = vand.u32 4294901760, %v763_v33 }
  0x18   : > { %v341_v17 = vsub.f32 %v269_v10, %v1719_v12  ;;  %1448 = vmatprep.subr.mxu0 %v1628_v3  ;;  %v1744_v20 = vand.u32 4294901760, %v1729_v15 }
  0x19   : > { %1449 = vmatpush3.msra.mxu0 %v1699_v6  ;;  %v378_v21 = vsub.f32 %v1717_v11, %v1733_v16  ;;  %v385_v23 = vsub.f32 %v1722_v13, %v1737_v18  ;;  %v392_v24 = vsub.f32 %v1726_v14, %v1741_v19  ;;  %v1802_v35 = vsub.f32 %v763_v33, %v1789_v34 }
  0x1a   : > { %v342_v22 = vand.u32 4294901760, %v341_v17  ;;  %1450 = vmatprep.subr.mxu0 %v1628_v3  ;;  %v399_v28 = vsub.f32 %v1729_v15, %v1744_v20 }
  0x1b   : > { %1451 = vmatpush3.msra.mxu0 %v1708_v9  ;;  %v1755_v25 = vand.u32 4294901760, %v378_v21  ;;  %v1757_v27 = vand.u32 4294901760, %v385_v23  ;;  %v1763_v30 = vand.u32 4294901760, %v392_v24  ;;  %v836_v36 = vand.u32 4294901760, %v1802_v35 }
  0x1c   : > { %v343_v26 = vsub.f32 %v341_v17, %v342_v22  ;;  %1466 = vmatprep.subr.mxu0 %v1628_v3  ;;  %v1767_v31 = vand.u32 4294901760, %v399_v28 }
  0x1d   : > { %1456 = vmatpush3.msra.mxu1 %v1755_v25  ;;  %v837_v37 = vsub.f32 %v1802_v35, %v836_v36 }
  0x1e   : > { %v344_v29 = vand.u32 4294901760, %v343_v26  ;;  %1457 = vmatprep.subr.mxu1 %v1628_v3 }
  0x1f   : > { %1458 = vmatpush3.msra.mxu1 %v1757_v27  ;;  %v838_v38 = vand.u32 4294901760, %v837_v37 }
  0x20   : > { %1453 = vmatmul.mubr.f32.vlgmr.msra.gmra.mxu0 %v344_v29  ;;  %1459 = vmatprep.subr.mxu1 %v1628_v3 }
  0x21   : > { %1467 = vmatpush3.msra.mxu0 %v1717_v11  ;;  %1460 = vmatpush3.msra.mxu1 %v1763_v30 }
  0x22   : > { %1468 = vmatprep.subr.mxu0 %v1628_v3  ;;  %1461 = vmatprep.subr.mxu1 %v1628_v3 }
  0x23   : > { %1469 = vmatpush3.msra.mxu0 %v1722_v13  ;;  %1462 = vmatpush3.msra.mxu1 %v1767_v31 }
  0x24   : > { %1470 = vmatprep.subr.mxu0 %v1628_v3  ;;  %1464 = vmatmul.mubr.f32.vlgmr.msra.gmra.mxu1 %v1719_v12 }
  0x25   : > { %1471 = vmatpush3.msra.mxu0 %v1726_v14  ;;  %1477 = vmatprep.subr.mxu1 %v1628_v3 }
  0x26   : > { %1472 = vmatprep.subr.mxu0 %v1628_v3  ;;  %1474 = vmatprep.mubr.msk.f32.mxu0 %vm1629_vm1, %v1628_v3 }
  0x27   : > { %1473 = vmatpush3.msra.mxu0 %v1729_v15  ;;  %1478 = vmatpush3.msra.mxu1 %v1695_v4 }
  0x28   : > { %1475 = vmatmul.mubr.f32.vlgmr.msra.gmra.mxu0 %v341_v17  ;;  %1479 = vmatprep.subr.mxu1 %v1628_v3 }
  0x29   : > { %1488 = vmatprep.subr.mxu0 %v1628_v3  ;;  %1480 = vmatpush3.msra.mxu1 %v1697_v5 }
  0x2a   : > { %1489 = vmatpush3.msra.mxu0 %v1733_v16  ;;  %1481 = vmatprep.subr.mxu1 %v1628_v3 }
  0x2b   : > { %1490 = vmatprep.subr.mxu0 %v1628_v3  ;;  %1482 = vmatpush3.msra.mxu1 %v1699_v6 }
  0x2c   : > { %1491 = vmatpush3.msra.mxu0 %v1737_v18  ;;  %1483 = vmatprep.subr.mxu1 %v1628_v3 }
  0x2d   : > { %1492 = vmatprep.subr.mxu0 %v1628_v3  ;;  %1484 = vmatpush3.msra.mxu1 %v1708_v9 }
  0x2e   : > { %1485 = vmatprep.mubr.msk.f32.mxu1 %vm1629_vm1, %v1628_v3  ;;  %1493 = vmatpush3.msra.mxu0 %v1741_v19 }
  0x2f   : > { %1486 = vmatmul.mubr.f32.vlgmr.msra.gmra.mxu1 %v342_v22  ;;  %1494 = vmatprep.subr.mxu0 %v1628_v3 }
  0x30   : > { %1499 = vmatprep.subr.mxu1 %v1628_v3  ;;  %1495 = vmatpush3.msra.mxu0 %v1744_v20 }
  0x31   : > { %1496 = vmatprep.mubr.msk.f32.mxu0 %vm1629_vm1, %v1628_v3  ;;  %1500 = vmatpush3.msra.mxu1 %v1695_v4 }
  0x32   : > { %1497 = vmatmul.mubr.f32.vlgmr.msra.gmra.mxu0 %v1719_v12  ;;  %1501 = vmatprep.subr.mxu1 %v1628_v3 }
  0x33   : > { %1510 = vmatprep.subr.mxu0 %v1628_v3  ;;  %1502 = vmatpush3.msra.mxu1 %v1697_v5 }
  0x34   : > { %1511 = vmatpush3.msra.mxu0 %v1695_v4  ;;  %1503 = vmatprep.subr.mxu1 %v1628_v3 }
  0x35   : > { %1512 = vmatprep.subr.mxu0 %v1628_v3  ;;  %1504 = vmatpush3.msra.mxu1 %v1699_v6 }
  0x36   : > { %1513 = vmatpush3.msra.mxu0 %v1697_v5  ;;  %1505 = vmatprep.subr.mxu1 %v1628_v3 }
  0x37   : > { %1514 = vmatprep.subr.mxu0 %v1628_v3  ;;  %1506 = vmatpush3.msra.mxu1 %v1708_v9 }
  0x38   : > { %1507 = vmatprep.mubr.msk.f32.mxu1 %vm1629_vm1, %v1628_v3  ;;  %1515 = vmatpush3.msra.mxu0 %v1699_v6 }
  0x39   : > { %1508 = vmatmul.mubr.f32.vlgmr.msra.gmra.mxu1 %v1719_v12  ;;  %1516 = vmatprep.subr.mxu0 %v1628_v3 }
  0x3a   : > { %1521 = vmatprep.subr.mxu1 %v1628_v3  ;;  %1517 = vmatpush3.msra.mxu0 %v1708_v9 }
  0x3b   : > { %1522 = vmatpush3.msra.mxu1 %v1755_v25  ;;  %1518 = vmatprep.mubr.msk.f32.mxu0 %vm1629_vm1, %v1628_v3 }
  0x3c   : > { %1523 = vmatprep.subr.mxu1 %v1628_v3  ;;  %1532 = vmatprep.subr.mxu0 %v1628_v3 }
  0x3d   : > { %1519 = vmatmul.mubr.f32.vlgmr.msra.gmra.mxu0 %v838_v38  ;;  %1524 = vmatpush3.msra.mxu1 %v1757_v27 }
  0x3e   : > { %1533 = vmatpush3.msra.mxu0 %v1717_v11  ;;  %1525 = vmatprep.subr.mxu1 %v1628_v3 }
  0x3f   : > { %1534 = vmatprep.subr.mxu0 %v1628_v3  ;;  %1526 = vmatpush3.msra.mxu1 %v1763_v30 }
  0x40   : > { %1535 = vmatpush3.msra.mxu0 %v1722_v13  ;;  %1527 = vmatprep.subr.mxu1 %v1628_v3 }
  0x41   : > { %1536 = vmatprep.subr.mxu0 %v1628_v3  ;;  %1528 = vmatpush3.msra.mxu1 %v1767_v31 }
  0x42   : > { %1529 = vmatprep.mubr.msk.f32.mxu1 %vm1629_vm1, %v1628_v3  ;;  %1537 = vmatpush3.msra.mxu0 %v1726_v14 }
  0x43   : > { %1530 = vmatmul.mubr.f32.vlgmr.msra.gmra.mxu1 %v1789_v34  ;;  %1538 = vmatprep.subr.mxu0 %v1628_v3 }
  0x44   : > { %1543 = vmatprep.subr.mxu1 %v1628_v3  ;;  %1539 = vmatpush3.msra.mxu0 %v1729_v15 }
  0x45   : > { %1540 = vmatprep.mubr.msk.f32.mxu0 %vm1629_vm1, %v1628_v3  ;;  %1544 = vmatpush3.msra.mxu1 %v1695_v4 }
  0x46   : > { %1541 = vmatmul.mubr.f32.vlgmr.msra.gmra.mxu0 %v1802_v35  ;;  %1545 = vmatprep.subr.mxu1 %v1628_v3 }
  0x47   : > { %1554 = vmatprep.subr.mxu0 %v1628_v3  ;;  %1546 = vmatpush3.msra.mxu1 %v1697_v5 }
  0x48   : > { %1555 = vmatpush3.msra.mxu0 %v1733_v16  ;;  %1547 = vmatprep.subr.mxu1 %v1628_v3 }
  0x49   : > { %1556 = vmatprep.subr.mxu0 %v1628_v3  ;;  %1548 = vmatpush3.msra.mxu1 %v1699_v6 }
  0x4a   : > { %1557 = vmatpush3.msra.mxu0 %v1737_v18  ;;  %1549 = vmatprep.subr.mxu1 %v1628_v3 }
  0x4b   : > { %1558 = vmatprep.subr.mxu0 %v1628_v3  ;;  %1550 = vmatpush3.msra.mxu1 %v1708_v9 }
  0x4c   : > { %1551 = vmatprep.mubr.msk.f32.mxu1 %vm1629_vm1, %v1628_v3  ;;  %1559 = vmatpush3.msra.mxu0 %v1741_v19 }
  0x4d   : > { %1552 = vmatmul.mubr.f32.vlgmr.msra.gmra.mxu1 %v836_v36  ;;  %1560 = vmatprep.subr.mxu0 %v1628_v3 }
  0x4e   : > { %1565 = vmatprep.subr.mxu1 %v1628_v3  ;;  %1561 = vmatpush3.msra.mxu0 %v1744_v20 }
  0x4f   : > { %1562 = vmatprep.mubr.msk.f32.mxu0 %vm1629_vm1, %v1628_v3  ;;  %1566 = vmatpush3.msra.mxu1 %v1695_v4 }
  0x50   : > { %1563 = vmatmul.mubr.f32.vlgmr.msra.gmra.mxu0 %v1789_v34  ;;  %1567 = vmatprep.subr.mxu1 %v1628_v3 }
  0x51   : > { %1573 = vmatprep.mubr.msk.f32.mxu1 %vm1629_vm1, %v1628_v3  ;;  %1568 = vmatpush3.msra.mxu1 %v1697_v5 }
  0x52   : > { %1569 = vmatprep.subr.mxu1 %v1628_v3 }
  0x53   : > { %1570 = vmatpush3.msra.mxu1 %v1699_v6 }
  0x54   : > { %1571 = vmatprep.subr.mxu1 %v1628_v3 }
  0x55   : > { %1572 = vmatpush3.msra.mxu1 %v1708_v9 }
  0x56   : > { %1574 = vmatmul.mubr.f32.vlgmr.msra.gmra.mxu1 %v1789_v34 }
  0xe0   : > { %v346_v39 = vpop.f32.mrf.mxu0 }
  0xe2   : > { %v1454_v40 = vpop.f32.mrf.mxu0 }
  0xe4   : > { %v437_v41 = vpop.f32.mrf.mxu1 }
  0xe5   : > { %v438_v45 = vadd.f32 %v437_v41, %v346_v39 }
  0xe6   : > { %v1465_v42 = vpop.f32.mrf.mxu1 }
  0xe8   : > { %v517_v43 = vpop.f32.mrf.mxu0 }
  0xe9   : > { %v518_v48 = vadd.f32 %v517_v43, %v438_v45 }
  0xea   : > { %v1476_v44 = vpop.f32.mrf.mxu0 }
  0xef   : > { %v594_v46 = vpop.f32.mrf.mxu1 }
  0xf0   : > { %v595_v50 = vadd.f32 %v594_v46, %v518_v48 }
  0xf1   : > { %v1487_v47 = vpop.f32.mrf.mxu1 }
  0xf2   : > { %v677_v49 = vpop.f32.mrf.mxu0 }
  0xf3   : > { %v678_v52 = vadd.f32 %v677_v49, %v595_v50 }
  0xf4   : > { %v1498_v51 = vpop.f32.mrf.mxu0 }
  0xf9   : > { %v752_v53 = vpop.f32.mrf.mxu1 }
  0xfa   : > { %v753_v54 = vadd.f32 %v752_v53, %v678_v52 }
  0xfb   : > { %v1509_v55 = vpop.f32.mrf.mxu1 }
  0xfc   : > { %756 = vst [vmem:[#allocation2] sm:$0xff] %v753_v54 }
  0xfd   : > { %v840_v56 = vpop.f32.mrf.mxu0 }
  0xff   : > { %v1520_v57 = vpop.f32.mrf.mxu0 }
 0x103   : > { %v931_v58 = vpop.f32.mrf.mxu1 }
 0x104   : > { %v932_v62 = vadd.f32 %v931_v58, %v840_v56 }
 0x105   : > { %v1531_v59 = vpop.f32.mrf.mxu1 }
 0x106   : > { %v1011_v60 = vpop.f32.mrf.mxu0 }
 0x107   : > { %v1012_v1 = vadd.f32 %v1011_v60, %v932_v62 }
 0x108   : > { %v1542_v61 = vpop.f32.mrf.mxu0 }
 0x10d   : > { %v1088_v63 = vpop.f32.mrf.mxu1 }
 0x10e   : > { %v1089_v3 = vadd.f32 %v1088_v63, %v1012_v1 }
 0x10f   : > { %v1553_v0 = vpop.f32.mrf.mxu1 }
 0x110   : > { %v1171_v2 = vpop.f32.mrf.mxu0 }
 0x111   : > { %v1172_v5 = vadd.f32 %v1171_v2, %v1089_v3 }
 0x112   : > { %v1564_v4 = vpop.f32.mrf.mxu0 }
 0x116   : > { %v1246_v6 = vpop.f32.mrf.mxu1 }
 0x117   : > { %v1247_v7 = vadd.f32 %v1246_v6, %v1172_v5 }
 0x118   : > { %v1575_v8 = vpop.f32.mrf.mxu1 }
 0x119   : > { %1250 = vst [vmem:[#allocation3] sm:$0xff] %v1247_v7 }
 0x11a PF: > { %v1251_v9 = vld [vmem:[%s1678_s23] sm:$0xff]  ;;  %s1630_s13 = smov 1   ;;  %s1631_s14 = smov 127   ;;  %v1256_v10 = vlaneseq }
 0x11b   : > { %1252 = vrot.lane.b32.xlu0 %v1251_v9, %s1630_s13  ;;  %v1261_v14 = vld [vmem:[#allocation2] sm:$0xff] }
 0x11c   : > { %v1257_v11 = vand.u32 127, %v1256_v10  ;;  %v1262_v16 = vmul.f32 %v1261_v14, %v1251_v9 }
 0x11e   : > { %v1258_v12 = vand.u32 1, %v1257_v11 }
 0x11f   : > { %1254 = vrot.lane.b32.xlu0 %v1251_v9, %s1631_s14 }
 0x120   : > { %vm1259_vm2 = vcmp.eq.s32.totalorder %v1258_v12, 0  ;;  %v1263_v15 = vld [vmem:[#allocation3] sm:$0xff] }
 0x18d   : > { %v1253_v13 = vpop.permute.xlu0 %1252 }
 0x191   : > { %v1255_v17 = vpop.permute.xlu0 %1254 }
 0x192   : > { %v1260_v18 = vsel %vm1259_vm2, %v1255_v17, %v1253_v13 }
 0x193   : > { %v1264_v19 = vmul.f32 %v1263_v15, %v1260_v18 }
 0x195   : > { %v1265_v20 = vadd.f32 %v1264_v19, %v1262_v16 }
 0x197   : > { %1266 = vst [vmem:[%s1683_s26] sm:$0xff] %v1265_v20 }
 0x198 PF: > { %s14_s17 = sadd.s32 1, %s1626_s17   ;;  %s1906_s15 = smov %s1622_s16 }
 0x199   : > { %p11_p6 = scmp.ge.s32.totalorder %s14_s17, 4   ;;  %s1907_s16 = smov %s1909_s18 }
 0x19b   :  { %13 = sbr.rel (!%p11_p6) target bundleno = 2 (0x2), region = 76 }

</bundles_post_ra>
